<compile_context>
chip_gen: v6e
topology: v6e:2x2x1
jax: 0.10.0
libtpu: 0.0.40
codegen_flags: <defaults>
</compile_context>

<pallas_src>
import functools

import numpy as np

import jax
import jax.numpy as jnp
from jax.experimental import pallas as pl
from jax.experimental.pallas import tpu as pltpu

# Navigation env default goal position (from raylab DEFAULT_CONFIG).
DEFAULT_END = (8.0, 9.0)

# ~1.5 MB of f32 payload per grid step; ~10 MiB of VMEM with double buffering.
DEFAULT_TB = 128 * 1024


def _round_up(n, m):
    return ((n + m - 1) // m) * m


def _static_end(end):
    """Return (end_x, end_y) as Python floats, or None if `end` is traced."""
    try:
        arr = np.asarray(end, dtype=np.float32).reshape(-1)
    except (jax.errors.TracerArrayConversionError,
            jax.errors.ConcretizationTypeError, TypeError, ValueError):
        return None
    return float(arr[0]), float(arr[1])


def _nav_term_kernel(ns_ref, out_ref, *, end_x, end_y):
    """Pure-VPU elementwise termination mask.

    ns_ref  : (3, tb) tile - rows are [x, y, time], lanes are batch.
    out_ref : (1, tb) int8 termination mask (lane-dense).

    NOTE: the (1, tb) row slices use 1/8 of each vreg, but VALU has enormous
    slack here - the kernel is DMA/overhead bound, so no micro-optimization.
    """
    x = ns_ref[0:1, :]
    y = ns_ref[1:2, :]
    t = ns_ref[2:3, :]
    # Comparisons happen in the input dtype (bf16 stays bf16; thresholds are
    # weakly-typed Python floats). Boundary cases |delta| ~= 0.1 may differ
    # from an f32 reference for bf16 inputs.
    hit_goal = (jnp.abs(x - end_x) <= 0.1) & (jnp.abs(y - end_y) <= 0.1)
    timeout = t >= 1.0
    out_ref[...] = (hit_goal | timeout).astype(jnp.int8)


def _nav_term_pallas(xyt, ends, *, tb):
    """xyt: (3, B) array, rows [x, y, time]. Returns bool (B,)."""
    end_x, end_y = ends
    three, B = xyt.shape
    assert three == 3
    if B == 0:
        return jnp.zeros((0,), jnp.bool_)

    # Lane-aligned block; keep >= 2 grid steps when B allows it so the
    # 'parallel' grid axis actually shards across both TCs on v7x.
    tb_eff = max(128, tb - (tb % 128))
    tb_eff = max(128, min(tb_eff, _round_up(pl.cdiv(B, 2), 128)))
    n_blocks = pl.cdiv(B, tb_eff)

    kernel = functools.partial(_nav_term_kernel, end_x=end_x, end_y=end_y)

    itemsize = jnp.dtype(xyt.dtype).itemsize
    out = pl.pallas_call(
        kernel,
        out_shape=jax.ShapeDtypeStruct((1, B), jnp.int8),
        grid=(n_blocks,),
        # No wrapper-side padding: the trailing partial block is read bounded
        # and stored masked by Pallas.
        in_specs=[pl.BlockSpec((3, tb_eff), lambda i: (0, i))],
        out_specs=pl.BlockSpec((1, tb_eff), lambda i: (0, i)),
        compiler_params=pltpu.CompilerParams(
            dimension_semantics=("parallel",)),
        cost_estimate=pl.CostEstimate(
            flops=6 * B, transcendentals=0,
            bytes_accessed=B * (3 * itemsize + 1)),
    )(xyt)

    # TODO(synk): write jnp.bool_ directly from the kernel once bool outputs
    # are guaranteed on all targeted Mosaic versions; int8 -> bool here costs
    # only ~2 B/elem on the (small) output path.
    return out[0].astype(jnp.bool_)


def navigation_termination_feature_major(ns_fm, end=DEFAULT_END, *, tb=DEFAULT_TB):
    """Pallas fast path for feature-major inputs.

    ns_fm: (D, B) feature-major next_state with rows [x, y, ..., time]
           (D == 3 is the zero-copy case). Returns bool (B,).
    """
    ends = _static_end(end)
    if ends is None:
        # Traced goal -> fused jnp fallback (Pallas path bakes the goal in).
        end_arr = jnp.asarray(end).reshape(-1)
        hit = (jnp.abs(ns_fm[0] - end_arr[0]) <= 0.1) & \
              (jnp.abs(ns_fm[1] - end_arr[1]) <= 0.1)
        return hit | (ns_fm[-1] >= 1)

    if ns_fm.shape[0] != 3:
        # Gather just the [x, y, time] rows: one 3-row pass independent of D,
        # so the kernel never DMAs more than 3 feature rows.
        ns_fm = jnp.concatenate([ns_fm[:2], ns_fm[-1:]], axis=0)
    return _nav_term_pallas(ns_fm, ends, tb=tb)


def navigation_termination(state, action, next_state, end=DEFAULT_END, *,
                           use_pallas=False, tb=DEFAULT_TB):
    """JAX equivalent of NavigationTermination.forward(state, action, next_state).

    `state`/`action` are unused (as in the PyTorch module). `next_state` has
    shape (..., D) with the time channel last; returns bool next_state.shape[:-1].

    For row-major inputs the fused jnp path is already HBM-roofline bound, so
    Pallas is only used when `use_pallas=True` (it needs a transposed view).
    Callers that can produce feature-major (3, B) data should use
    `navigation_termination_feature_major` for the copy-free Pallas path.
    """
    del state, action  # unused by the termination function

    lead_shape = next_state.shape[:-1]
    D = next_state.shape[-1]
    ns2d = next_state.reshape((-1, D))
    B = ns2d.shape[0]

    ends = _static_end(end)

    if use_pallas and ends is not None and B > 0:
        # Standalone (B, D) -> (3, B) gather pass; only worth it when the
        # feature-major layout cannot be produced upstream.
        xyt = jnp.stack([ns2d[:, 0], ns2d[:, 1], ns2d[:, -1]], axis=0)
        done = _nav_term_pallas(xyt, ends, tb=tb)
        return done.reshape(lead_shape)

    # Fused elementwise jnp path (single HBM pass, roofline-bound).
    end_arr = jnp.asarray(end, dtype=jnp.float32).reshape(-1)
    hit_goal = jnp.all(jnp.abs(ns2d[:, :2] - end_arr) <= 0.1, axis=-1)
    timeout = ns2d[:, -1] >= 1
    return (hit_goal | timeout).reshape(lead_shape)


def _reference(next_state, end=DEFAULT_END):
    end_arr = jnp.asarray(end, dtype=jnp.float32)
    hit_goal = jnp.all(jnp.abs(next_state[..., :2] - end_arr) <= 0.1, axis=-1)
    timeout = next_state[..., -1] >= 1.0
    return hit_goal | timeout


if __name__ == "__main__":
    key = jax.random.PRNGKey(0)
    k1, k2, k3 = jax.random.split(key, 3)

    B = 300           # not a multiple of 128 -> exercises the partial last block
    STATE_DIM = 3     # [x, y, time]
    ACTION_DIM = 2

    state = jax.random.normal(k1, (B, STATE_DIM), dtype=jnp.float32)
    action = jax.random.normal(k2, (B, ACTION_DIM), dtype=jnp.float32)
    # Positions near the goal plus a time channel that sometimes exceeds 1 so
    # both termination branches are exercised.
    end = jnp.asarray(DEFAULT_END, dtype=jnp.float32)
    pos = end + 0.2 * jax.random.normal(k3, (B, 2), dtype=jnp.float32)
    time = jnp.linspace(0.0, 1.5, B, dtype=jnp.float32)[:, None]
    next_state = jnp.concatenate([pos, time], axis=-1)

    expected = _reference(next_state)

    # 1) Feature-major Pallas fast path (the transpose here is test scaffolding
    #    standing in for a producer that emits (3, B) directly).
    xyt = jnp.transpose(next_state)                       # (3, B)
    done_fm = navigation_termination_feature_major(xyt)   # default tb, 2 blocks
    done_fm = jax.block_until_ready(done_fm)
    assert done_fm.shape == (B,)
    assert done_fm.dtype == jnp.bool_
    assert bool(jnp.all(done_fm == expected))

    # Small block size: 3 grid steps incl. a masked partial trailing block.
    done_fm_small_tb = navigation_termination_feature_major(xyt, tb=128)
    done_fm_small_tb = jax.block_until_ready(done_fm_small_tb)
    assert bool(jnp.all(done_fm_small_tb == expected))

    # 2) Module-signature wrapper, forced onto the Pallas path.
    done_rm = navigation_termination(state, action, next_state, use_pallas=True)
    done_rm = jax.block_until_ready(done_rm)
    assert done_rm.shape == (B,)
    assert done_rm.dtype == jnp.bool_
    assert bool(jnp.all(done_rm == expected))

    # 3) Module-signature wrapper, default fused-jnp path (row-major optimum),
    #    including a tiny batch.
    done_jnp = navigation_termination(state, action, next_state)
    done_jnp = jax.block_until_ready(done_jnp)
    assert bool(jnp.all(done_jnp == expected))

    done_small = navigation_termination(state[:16], action[:16], next_state[:16])
    done_small = jax.block_until_ready(done_small)
    assert done_small.shape == (16,)
    assert bool(jnp.all(done_small == expected[:16]))

    print("KERNEL_OK")
</pallas_src>

<mosaic_0001>
module attributes {stable_mosaic.version = 11 : i64} {
  func.func @_nav_term_kernel(%arg0: i32, %arg1: memref<3x256xf32, #tpu.memory_space<vmem>>, %arg2: memref<1x256xi8, #tpu.memory_space<vmem>>) attributes {dimension_semantics = [#tpu.dimension_semantics<parallel>], iteration_bounds = array<i64: 2>, scalar_prefetch = 0 : i64, scratch_operands = 0 : i64, tpu.core_type = #tpu.core_type<tc>, window_params = [{transform_indices = @transform_0, window_bounds = array<i64: 3, 256>}, {transform_indices = @transform_1, window_bounds = array<i64: 1, 256>}]} {
    %c0 = arith.constant 0 : index
    %c0_0 = arith.constant 0 : index
    %0 = vector.load %arg1[%c0, %c0_0] : memref<3x256xf32, #tpu.memory_space<vmem>>, vector<1x256xf32>
    %c1 = arith.constant 1 : index
    %c0_1 = arith.constant 0 : index
    %1 = vector.load %arg1[%c1, %c0_1] : memref<3x256xf32, #tpu.memory_space<vmem>>, vector<1x256xf32>
    %c2 = arith.constant 2 : index
    %c0_2 = arith.constant 0 : index
    %2 = vector.load %arg1[%c2, %c0_2] : memref<3x256xf32, #tpu.memory_space<vmem>>, vector<1x256xf32>
    %cst = arith.constant 8.000000e+00 : f32
    %3 = vector.broadcast %cst : f32 to vector<1x256xf32>
    %4 = arith.subf %0, %3 : vector<1x256xf32>
    %5 = math.absf %4 : vector<1x256xf32>
    %cst_3 = arith.constant 1.000000e-01 : f32
    %6 = vector.broadcast %cst_3 : f32 to vector<1x256xf32>
    %7 = arith.cmpf ole, %5, %6 : vector<1x256xf32>
    %cst_4 = arith.constant 9.000000e+00 : f32
    %8 = vector.broadcast %cst_4 : f32 to vector<1x256xf32>
    %9 = arith.subf %1, %8 : vector<1x256xf32>
    %10 = math.absf %9 : vector<1x256xf32>
    %cst_5 = arith.constant 1.000000e-01 : f32
    %11 = vector.broadcast %cst_5 : f32 to vector<1x256xf32>
    %12 = arith.cmpf ole, %10, %11 : vector<1x256xf32>
    %13 = arith.andi %7, %12 : vector<1x256xi1>
    %cst_6 = arith.constant 1.000000e+00 : f32
    %14 = vector.broadcast %cst_6 : f32 to vector<1x256xf32>
    %15 = arith.cmpf oge, %2, %14 : vector<1x256xf32>
    %16 = arith.ori %13, %15 : vector<1x256xi1>
    %17 = arith.extui %16 : vector<1x256xi1> to vector<1x256xi8>
    %c0_7 = arith.constant 0 : index
    %c0_8 = arith.constant 0 : index
    %18 = vector.load %arg2[%c0_7, %c0_8] : memref<1x256xi8, #tpu.memory_space<vmem>>, vector<1x256xi8>
    tpu.vector_store %arg2[%c0_7, %c0_8], %17 {strides = array<i32>} : memref<1x256xi8, #tpu.memory_space<vmem>>, vector<1x256xi8>,
    return
  }
  func.func @transform_0(%arg0: i32) -> (i32, i32) {
    %c0_i32 = arith.constant 0 : i32
    %c0_i32_0 = arith.constant 0 : i32
    return %c0_i32, %arg0 : i32, i32
  }
  func.func @transform_1(%arg0: i32) -> (i32, i32) {
    %c0_i32 = arith.constant 0 : i32
    %c0_i32_0 = arith.constant 0 : i32
    return %c0_i32, %arg0 : i32, i32
  }
}

</mosaic_0001>

<bundles_post_ra>
// kernel: tpu_custom_call.1
= control target key start
LH: loop header
LB: loop body
LE: loop exit
PB: predicated region body
PF: predicated region fallthrough
CT: control target
= control target key end

     0   :  { %6 = vsyncpa [#allocation3], 0  ;;  %s640_s0 = inlined_call_operand.hbm [shape: f32[3,300], index: 0, kind: input, shape index: {}]   ;;  %s641_s1 = inlined_call_operand.hbm [shape: s8[1,300], index: 1, kind: output, shape index: {}]  }
   0x1   :  { %8 = vsyncpa [#allocation3 + $0x1], 0 }
   0x2   :  { %9 = vsyncpa [#allocation4], 0 }
   0x3   :  { %11 = vsyncpa [#allocation4 + $0x1], 0  ;;  %s495_s6 = smov 0   ;;  %s497_s7 = smov 0  }
   0x4   :  { %s499_s8 = smov 0   ;;  %s501_s9 = smov 0  }
   0x5 LB: > { %s516_s10 = sadd.s32 4294967295, %s478_s9   ;;  %s320_s11 = sadd.s32 4294967294, %s478_s9   ;;  %s478_s9 = sphi %s501_s9, %s652_s9   ;;  %s474_s8 = sphi %s499_s8, %s651_s8   ;;  %s470_s7 = sphi %s497_s7, %s650_s7   ;;  %s466_s6 = sphi %s495_s6, %s649_s6  }
   0x6   : > { %s520_s12 = sadd.s32 1, %s478_s9   ;;  %s24_s13 = sadd.s32 1, %s474_s8 }
   0x7   : > { %s21_s14 = ssub.s32 %s478_s9, %s520_s12  ;;  %p31_p0 = scmp.ne.s32.totalorder %s474_s8, %s470_s7 }
   0x8   : > { %p22_p1 = scmp.eq.s32.totalorder %s21_s14, 0  ;;  %p32_p2 = scmp.eq.s32.totalorder %s478_s9, 0 }
   0x9   : > { %p37_p3 = scmp.ne.s32.totalorder %s470_s7, %s466_s6  ;;  %p38_p4 = scmp.eq.s32.totalorder %s516_s10, 0 }
   0xa   : > { %s532_s15 = scalar_select %p22_p1, %s474_s8, %s24_s13  }
   0xb   : > { %p33_p5 = por %p32_p2, %p31_p0  ;;  %p534_p6 = por %p38_p4, %p37_p3 }
   0xc   : > { %p61_p7 = scmp.eq.s32.totalorder %s516_s10, 1  ;;  %p67_p8 = scmp.eq.s32.totalorder %s320_s11, 1 }
   0xd   : > { %p642_p11 = scmp.ge.s32.totalorder %s478_s9, 2 }
   0xe   : > { %p539_p9 = por %p61_p7, %p31_p0  ;;  %p543_p10 = por %p67_p8, %p37_p3 }
   0xf   : > { %83 = sbr.rel (%p642_p11) target bundleno = 51 (0x33), region = 16 }
  0x10   : > { %s644_s17 = scalar_select %p539_p9, 1, 0 }
  0x11   : > { %s645_s18 = scalar_select %p543_p10, 1, 0 }
  0x14   : > { %86 = sbr.rel (!%p33_p5) target bundleno = 51 (0x33), region = 20  ;;  %s87_s19 = sand.u32 (%p33_p5), 1, %s474_s8  }
  0x15   : > { %s324_s20 = sshll.u32 (%p33_p5), %s478_s9, 1  ;;  %s323_s21 = sshll.u32 (%p33_p5), %s87_s19, 3 }
  0x16   : > { %s93_s22 = ssub.s32 (%p33_p5), 3, %s324_s20  ;;  %s555_s25 = scalar_lea.sflag (%p33_p5), [#allocation3], %s87_s19 }
  0x17   : > { %p94_p12 = scmp.lt.s32.totalorder (%p33_p5), %s93_s22, 2  ;;  %s91_s26 = scalar_lea.vmem (%p33_p5), [#allocation2], %s323_s21 }
  0x19   : > { %s654_s22 = smov (!%p94_p12, %s93_s22), 2 }
  0x1a   : > { %s552_s23 = sshll.u32 %s654_s22, 6 }
  0x1b   : > { %s98_s24 = ssub.s32 128, %s552_s23 }
  0x1c   : > { %99 = vsyncadd %s555_s25, %s98_s24  ;;  %p326_p13 = scmp.ne.s32.totalorder %s552_s23, 0  ;;  %s344_s27 = sshll.u32 %s478_s9, 7 }
  0x1d   : > { %s102_s30 = scalar_lea.hbm %s640_s0, %s344_s27  ;;  %s105_s2 = sshll.u32 %s91_s26, 4  ;;  %s106_s2 = int_to_ptr.vmem [resolvable:$true] %s105_s2 }
  0x1e   : > { %s388_s3 = scalar_lea.hbm %s102_s30, %s552_s23  ;;  %s392_s11 = scalar_lea.hbm %s640_s0, 192 }
  0x1f   : > { %p389_p0 = scmp.ne.s32.totalorder %s102_s30, %s388_s3  ;;  %p393_p3 = scmp.lt.s32.totalorder %s102_s30, %s640_s0 }
  0x20   : > { %p394_p4 = scmp.lt.s32.totalorder %s392_s11, %s388_s3 }
  0x21   : > { %p390_p1 = pnand %p389_p0, %p326_p13 }
  0x22   : > { %p395_p5 = por %p394_p4, %p393_p3 }
  0x23   : > { %p391_p2 = pneg %p390_p1 }
  0x25   : > { %p396_p7 = pnand %p395_p5, %p391_p2 }
  0x27   : > { %399 = shalt.err (!%p396_p7)
}
  0x28   : > { %s400_s19 = scalar_lea.vmem %s106_s2, %s552_s23  ;;  %s480_s20 = smov [#allocation2]  }
  0x29   : > { %p401_p8 = scmp.ne.s32.totalorder %s106_s2, %s400_s19  ;;  %s404_s21 = sshll.u32 %s480_s20, 4  ;;  %s405_s21 = int_to_ptr.vmem [resolvable:$false] %s404_s21 }
  0x2a   : > { %s406_s22 = scalar_lea.vmem %s405_s21, 256  ;;  %p407_p1 = scmp.lt.s32.totalorder %s106_s2, %s405_s21 }
  0x2b   : > { %p402_p12 = pnand %p401_p8, %p326_p13  ;;  %p408_p11 = scmp.lt.s32.totalorder %s406_s22, %s400_s19 }
  0x2d   : > { %p403_p0 = pneg %p402_p12  ;;  %p409_p10 = por %p408_p11, %p407_p1 }
  0x2f   : > { %p410_p9 = pnand %p409_p10, %p403_p0 }
  0x31   : > { %413 = shalt.err (!%p410_p9)
}
  0x32   : > { %108 = dma.hbm_to_vmem [thread:$0]  (%p326_p13), %s102_s30, %s552_s23, %s106_s2, %s555_s25  }
  0x33 PF: > { %p330_p2 = scmp.ge.s32.totalorder %s478_s9, 1  ;;  %p110_p3 = scmp.lt.s32.totalorder %s478_s9, 3 }
  0x35   : > { %p111_p4 = pnand %p330_p2, %p110_p3 }
  0x36   : > { %s582_s24 = sand.u32 (!%p111_p4), 1, %s470_s7  }
  0x37   : > { %114 = sbr.rel (%p111_p4) target bundleno = 123 (0x7b), region = 24  ;;  %s331_s26 = sshll.u32 (!%p111_p4), %s582_s24, 3 }
  0x38   : > { %s117_s27 = scalar_lea.sflag (!%p111_p4), [#allocation3], %s582_s24  ;;  %s120_s28 = scalar_lea.vmem (!%p111_p4), [#allocation2], %s331_s26 }
  0x3c   : > { %457 = dma.done.wait (%p534_p6), %s117_s27, 128  }
  0x3d   : > { %459 = vsyncadd (%p534_p6), %s117_s27, 4294967168  ;;  %v481_v0 = vmov 286326784   ;;  %v169_v2 = vlaneseq  ;;  %v151_v3 = vld [vmem:[%s120_s28] ss:$4 sm:$0x3]  ;;  %v483_v15 = vmov 0  }
  0x3e   : > { %v167_v1 = vunpack.c.l.s4 %v481_v0  ;;  %v333_v4 = vld [vmem:[%s120_s28 + $0x1] ss:$4 sm:$0x3]  ;;  %v334_v5 = vld [vmem:[%s120_s28 + $0x2] ss:$4 sm:$0x3] }
  0x3f   : > { %v335_v6 = vadd.f32 -8.0, %v151_v3  ;;  %v336_v7 = vadd.f32 -9.0, %v333_v4  ;;  %v170_v9 = vshrl.u32 %v169_v2, 7  ;;  %vm163_vm0 = vcmp.ge.f32.partialorder %v334_v5, 1.0  ;;  %s332_s16 = sshll.u32 %s582_s24, 1  ;;  %s231_s25 = scalar_lea.sflag [#allocation4], %s582_s24 }
  0x40   : > { %v168_v8 = vunpack.c.0.s8 %v167_v1  ;;  %v482_v13 = vmov 1966171168   ;;  %vm220_vm8 = vcmask 1040384   ;;  %vm221_vm9 = vsmask.f32 0  ;;  %s138_s23 = scalar_lea.vmem [#allocation5], %s332_s16 }
  0x41   : > { %v157_v10 = vand.u32 2147483647, %v335_v6  ;;  %v160_v11 = vand.u32 2147483647, %v336_v7  ;;  %v180_v14 = vunpack.c.l.s4 %v482_v13  ;;  %vm223_vm10 = vcmask 1041409   ;;  %vm222_vm13 = vmand %vm220_vm8, %vm221_vm9  ;;  %p646_p6 = scmp.ne.s32.totalorder %s644_s17, 0 }
  0x42   : > { %v171_v12 = vsub.s32 %v168_v8, %v170_v9  ;;  %vm224_vm11 = vsmask.f32 1024  ;;  %v227_v32 = vld [vmem:[%s138_s23] sm:$0x3]  ;;  %s338_s29 = sshll.u32 (%p646_p6), %s516_s10, 1 }
  0x43   : > { %vm158_vm1 = vcmp.le.f32.partialorder %v157_v10, 0.1  ;;  %vm161_vm2 = vcmp.le.f32.partialorder %v160_v11, 0.1  ;;  %v181_v18 = vunpack.c.0.s8 %v180_v14  ;;  %vm225_vm14 = vmand %vm223_vm10, %vm224_vm11  ;;  %s239_s30 = ssub.s32 (%p646_p6), 3, %s338_s29 }
  0x44   : > { %vm162_vm3 = vmand %vm158_vm1, %vm161_vm2  ;;  %p240_p9 = scmp.lt.s32.totalorder (%p646_p6), %s239_s30, 2 }
  0x45   : > { %vm164_vm4 = vmor %vm162_vm3, %vm163_vm0  ;;  %v184_v22 = vsub.s32 %v181_v18, %v170_v9 }
  0x46   : > { %v165_v16 = vsel %vm164_vm4, 1, %v483_v15  ;;  %vm226_vm15 = vmor %vm225_vm14, %vm222_vm13 }
  0x47   : > { %v172_v17 = vrot.slane %v165_v16, %v171_v12 }
  0x49   : > { %vm173_vm5 = vcmp.ne.s32.totalorder %v172_v17, 0 }
  0x4a   : > { %v174_v19 = vsel %vm173_vm5, 1, %v483_v15 }
  0x4b   : > { %v175_v20 = vpack.c.b16 %v174_v19, %v174_v19 }
  0x4d   : > { %v176_v21 = vpack.c.b8 %v175_v20, %v175_v20 }
  0x4f   : > { %vm177_vm6 = vnez %v176_v21 }
  0x50   : > { %v178_v23 = vsel %vm177_vm6, 16843009, %v483_v15 }
  0x51   : > { %v185_v24 = vrot.slane %v178_v23, %v184_v22 }
  0x53   : > { %v186_v25 = vcombine.high %v185_v24, %v185_v24  ;;  %v193_v26 = vrot.slane %v185_v24, %v184_v22 }
  0x55   : > { %v200_v27 = vrot.slane %v186_v25, %v184_v22  ;;  %vm201_vm7 = vnez %v193_v26 }
  0x56   : > { %v203_v28 = vsel %vm201_vm7, 16843009, %v483_v15 }
  0x57   : > { %vm202_vm12 = vnez %v200_v27 }
  0x58   : > { %v204_v29 = vsel %vm202_vm12, 16843009, %v483_v15 }
  0x59   : > { %v205_v30 = vcombine.low %v203_v28, %v204_v29 }
  0x5b   : > { %v212_v31 = vrot.slane %v205_v30, %v184_v22 }
  0x5c   : > { %237 = sbr.rel (!%p646_p6) target bundleno = 123 (0x7b), region = 32 }
  0x5d   : > { %v219_v33 = vrot.slane %v212_v31, %v184_v22 }
  0x5f   : > { %v228_v34 = vsel %vm226_vm15, %v219_v33, %v227_v32 }
  0x60   : > { %229 = vst [vmem:[%s138_s23] sm:$0x3] %v228_v34 }
  0x61   : > { %s656_s30 = smov (!%p240_p9, %s239_s30), 2 }
  0x62   : > { %s595_s2 = sshll.u32 %s656_s30, 4 }
  0x63   : > { %s244_s3 = ssub.s32 32, %s595_s2 }
  0x64   : > { %245 = vsyncadd %s231_s25, %s244_s3  ;;  %p340_p10 = scmp.ne.s32.totalorder %s595_s2, 0  ;;  %s345_s4 = sshll.u32 %s516_s10, 5 }
  0x65   : > { %s248_s11 = scalar_lea.hbm %s641_s1, %s345_s4  ;;  %s250_s13 = sshll.u32 %s138_s23, 4  ;;  %s251_s13 = int_to_ptr.vmem [resolvable:$true] %s250_s13 }
  0x66   : > { %s414_s14 = scalar_lea.vmem %s251_s13, %s595_s2  ;;  %s484_s19 = smov [#allocation5]  }
  0x67   : > { %p415_p11 = scmp.ne.s32.totalorder %s251_s13, %s414_s14  ;;  %s418_s20 = sshll.u32 %s484_s19, 4  ;;  %s419_s20 = int_to_ptr.vmem [resolvable:$false] %s418_s20 }
  0x68   : > { %s420_s21 = scalar_lea.vmem %s419_s20, 64  ;;  %p421_p7 = scmp.lt.s32.totalorder %s251_s13, %s419_s20 }
  0x69   : > { %p416_p13 = pnand %p415_p11, %p340_p10  ;;  %p422_p8 = scmp.lt.s32.totalorder %s420_s21, %s414_s14 }
  0x6b   : > { %p417_p5 = pneg %p416_p13  ;;  %p423_p12 = por %p422_p8, %p421_p7 }
  0x6d   : > { %p424_p0 = pnand %p423_p12, %p417_p5 }
  0x6f   : > { %427 = shalt.err (!%p424_p0)
}
  0x70   : > { %s428_s10 = scalar_lea.hbm %s248_s11, %s595_s2  ;;  %s432_s27 = scalar_lea.hbm %s641_s1, 48 }
  0x71   : > { %p429_p1 = scmp.ne.s32.totalorder %s248_s11, %s428_s10  ;;  %p433_p4 = scmp.lt.s32.totalorder %s248_s11, %s641_s1 }
  0x72   : > { %p434_p6 = scmp.lt.s32.totalorder %s432_s27, %s428_s10 }
  0x73   : > { %p430_p2 = pnand %p429_p1, %p340_p10 }
  0x74   : > { %p435_p9 = por %p434_p6, %p433_p4 }
  0x75   : > { %p431_p3 = pneg %p430_p2 }
  0x77   : > { %p436_p11 = pnand %p435_p9, %p431_p3 }
  0x79   : > { %439 = shalt.err (!%p436_p11)
}
  0x7a   : > { %253 = dma.vmem_to_hbm [thread:$0]  (%p340_p10), %s251_s13, %s595_s2, %s248_s11, %s231_s25  }
  0x7b PF: > { %s262_s23 = sand.u32 1, %s466_s6   ;;  %p647_p13 = scmp.ne.s32.totalorder %s645_s18, 0 }
  0x7c   : > { %p648_p5 = scmp.ge.s32.totalorder %s478_s9, 2  ;;  %s263_s29 = scalar_lea.sflag [#allocation4], %s262_s23 }
  0x7e   : > { %p349_p7 = pnand %p648_p5, %p647_p13 }
  0x80   : > { %p350_p8 = pneg %p349_p7 }
  0x82   : > { %461 = dma.done.wait (%p350_p8), %s263_s29, 32  }
  0x83   : > { %463 = vsyncadd (%p350_p8), %s263_s29, 4294967264  ;;  %p14_p12 = scmp.ge.s32.totalorder %s520_s12, 4   ;;  %s649_s6 = smov %s470_s7 }
  0x84   : > { %s650_s7 = smov %s474_s8  ;;  %s651_s8 = smov %s532_s15 }
  0x85   : > { %s652_s9 = smov %s520_s12  ;;  %16 = sbr.rel (!%p14_p12) target bundleno = 5 (0x5), region = 71 }
  0x8a   :  { %268 = vsyncpa [#allocation3], 1 }
  0x8b   :  { %270 = vsyncpa [#allocation3 + $0x1], 1 }
  0x8c   :  { %271 = vsyncpa [#allocation4], 1 }
  0x8d   :  { %273 = vsyncpa [#allocation4 + $0x1], 1 }

</bundles_post_ra>
